<compile_context>
chip_gen: v5e
topology: v5e:2x2
jax: 0.10.0
libtpu: 0.0.40
codegen_flags: <defaults>
</compile_context>

<pallas_src>
import functools

import jax
import jax.numpy as jnp
from jax.experimental import pallas as pl
from jax.experimental.pallas import tpu as pltpu


def _round_up(x, m):
    return (x + m - 1) // m * m


def primary_caps_kernel(x_ref, w_ref, b_ref, out_ref, *, n_pose):
    # x_ref:   (tile_b, C)         flattened activations (zero-padded rows ok)
    # w_ref:   (C, out_dim)        merged [w_pose | w_a] (resident across grid)
    # b_ref:   (1, out_dim)        merged bias row
    # out_ref: (tile_b, out_dim)   [pose | sigmoid(act)]
    y = jnp.dot(x_ref[...], w_ref[...], preferred_element_type=jnp.float32)
    y = y + b_ref[...]
    # Lane-dense full-width store of the linear result, then overwrite only
    # the activation slab with its sigmoid.  n_pose is a multiple of 128, so
    # the slice start is lane-group aligned and only those lanes hit the EUP.
    out_ref[...] = y.astype(out_ref.dtype)
    out_ref[:, n_pose:] = jax.nn.sigmoid(y[:, n_pose:]).astype(out_ref.dtype)


def merge_params(w_pose, b_pose, w_a, b_a):
    """One-time fusion of both 1x1-conv heads into a single matmul weight/bias.

    Call once at init; keeps the per-forward critical path free of the
    concatenate/cast plumbing.
    """
    w_merged = jnp.concatenate(
        [w_pose.astype(jnp.float32), w_a.astype(jnp.float32)], axis=1)
    b_merged = jnp.concatenate(
        [b_pose.astype(jnp.float32), b_a.astype(jnp.float32)], axis=1)
    return w_merged, b_merged, w_pose.shape[1]


def primary_caps_forward(x, w_merged, b_merged, n_pose, *, max_tile_b=1024):
    """x: (b, T, h, w) NCHW; w_merged: (C, out_dim); b_merged: (1, out_dim)."""
    b, T, h, w = x.shape
    C = T * h * w
    assert w_merged.shape[0] == C and b_merged.shape == (1, w_merged.shape[1])
    out_dim = w_merged.shape[1]
    # Static-slice sigmoid needs a lane-group-aligned split (true for B=32, P=4).
    assert n_pose % 128 == 0, "n_pose must be a multiple of 128 for the sliced sigmoid"

    # Same row-major flatten as torch.reshape(b, h*w*T, 1, 1) on contiguous NCHW.
    x_flat = x.reshape(b, C).astype(jnp.float32)

    # Batch tiling: pick num_tiles first so padding waste is bounded to <8
    # rows per tile; keep >=2 grid steps once the batch is big enough so both
    # v7x TensorCores get work on the "parallel" axis; a single-tile batch
    # uses the exact batch size (block == full array -> no pad, no slice).
    num_tiles = pl.cdiv(b, max_tile_b)
    if num_tiles == 1 and b >= 16:
        num_tiles = 2
    if num_tiles == 1:
        tile_b, b_pad = b, b
    else:
        tile_b = _round_up(pl.cdiv(b, num_tiles), 8)
        b_pad = num_tiles * tile_b
    if b_pad != b:
        x_flat = jnp.pad(x_flat, ((0, b_pad - b), (0, 0)))

    out = pl.pallas_call(
        functools.partial(primary_caps_kernel, n_pose=n_pose),
        out_shape=jax.ShapeDtypeStruct((b_pad, out_dim), jnp.float32),
        grid_spec=pltpu.PrefetchScalarGridSpec(
            num_scalar_prefetch=0,
            grid=(num_tiles,),
            in_specs=[
                pl.BlockSpec((tile_b, C), lambda i: (i, 0)),
                pl.BlockSpec((C, out_dim), lambda i: (0, 0)),   # resident weight
                pl.BlockSpec((1, out_dim), lambda i: (0, 0)),   # resident bias
            ],
            out_specs=pl.BlockSpec((tile_b, out_dim), lambda i: (i, 0)),
        ),
        compiler_params=pltpu.CompilerParams(
            dimension_semantics=("parallel",),
            # ~6.5 MiB peak at tile_b=1024 (double-buffered x/out + weight);
            # fits comfortably on v5e/v6e (128 MiB) and v7x (64 MiB).
            vmem_limit_bytes=16 * 1024 * 1024,
        ),
    )(x_flat, w_merged, b_merged)

    if b_pad != b:
        out = out[:b]
    # (b, out, 1, 1).permute(0, 2, 3, 1) -> (b, 1, 1, out); contiguous reshape, free.
    return out.reshape(b, 1, 1, out_dim)


def init_params(key, A=32, B=32, P=4, h=2, w=2):
    """Deterministic synthetic init matching the nn.Conv2d parameter shapes.

    pose: Conv2d(A*h*w, B*P*P, k=1) -> weight (B*P*P, A*h*w, 1, 1), bias (B*P*P,)
    a:    Conv2d(A*h*w, B,     k=1) -> weight (B,     A*h*w, 1, 1), bias (B,)
    Stored here transposed as (in, out) for the matmul, biases as (1, out).
    """
    C = A * h * w
    n_pose = B * P * P
    kp, kpb, ka, kab = jax.random.split(key, 4)
    bound = 1.0 / jnp.sqrt(jnp.float32(C))  # PyTorch-style fan_in uniform bound
    w_pose = jax.random.uniform(kp, (C, n_pose), jnp.float32, -bound, bound)
    b_pose = jax.random.uniform(kpb, (1, n_pose), jnp.float32, -bound, bound)
    w_a = jax.random.uniform(ka, (C, B), jnp.float32, -bound, bound)
    b_a = jax.random.uniform(kab, (1, B), jnp.float32, -bound, bound)
    return w_pose, b_pose, w_a, b_a


def reference_forward(x, w_pose, b_pose, w_a, b_a):
    """Pure-JAX reference mirroring the PyTorch module."""
    b = x.shape[0]
    x_flat = x.reshape(b, -1)
    p = x_flat @ w_pose + b_pose
    a = jax.nn.sigmoid(x_flat @ w_a + b_a)
    return jnp.concatenate([p, a], axis=-1).reshape(b, 1, 1, -1)


if __name__ == "__main__":
    A, B, P, K, stride, h, w = 32, 32, 4, 1, 1, 2, 2
    batch = 2

    key = jax.random.PRNGKey(0)
    kx, kparams = jax.random.split(key)

    # input: (*, A, h, w) NCHW, consistent with the module's forward
    x = jax.random.normal(kx, (batch, A, h, w), dtype=jnp.float32)
    w_pose, b_pose, w_a, b_a = init_params(kparams, A=A, B=B, P=P, h=h, w=w)

    # One-time parameter merge (kept off the per-forward critical path).
    w_merged, b_merged, n_pose = merge_params(w_pose, b_pose, w_a, b_a)
    w_merged, b_merged = jax.block_until_ready((w_merged, b_merged))

    out = primary_caps_forward(x, w_merged, b_merged, n_pose)
    out = jax.block_until_ready(out)

    expected_shape = (batch, 1, 1, B * P * P + B)
    assert out.shape == expected_shape, (out.shape, expected_shape)

    ref = reference_forward(x, w_pose, b_pose, w_a, b_a)
    assert jnp.allclose(out, ref, atol=1e-5, rtol=1e-5), "Pallas output mismatch vs reference"

    print("KERNEL_OK")
</pallas_src>

<mosaic_0001>
module attributes {stable_mosaic.version = 11 : i64} {
  func.func @primary_caps_kernel(%arg0: i32, %arg1: memref<2x128xf32, #tpu.memory_space<vmem>>, %arg2: memref<128x544xf32, #tpu.memory_space<vmem>>, %arg3: memref<1x544xf32, #tpu.memory_space<vmem>>, %arg4: memref<2x544xf32, #tpu.memory_space<vmem>>) attributes {dimension_semantics = [#tpu.dimension_semantics<parallel>], iteration_bounds = array<i64: 1>, scalar_prefetch = 0 : i64, scratch_operands = 0 : i64, tpu.core_type = #tpu.core_type<tc>, window_params = [{transform_indices = @transform_0, window_bounds = array<i64: 2, 128>}, {pipeline_mode = #tpu.pipeline_mode<synchronous>, transform_indices = @transform_1, window_bounds = array<i64: 128, 544>}, {pipeline_mode = #tpu.pipeline_mode<synchronous>, transform_indices = @transform_2, window_bounds = array<i64: 1, 544>}, {transform_indices = @transform_3, window_bounds = array<i64: 2, 544>}]} {
    %c0 = arith.constant 0 : index
    %c0_0 = arith.constant 0 : index
    %0 = vector.load %arg1[%c0, %c0_0] : memref<2x128xf32, #tpu.memory_space<vmem>>, vector<2x128xf32>
    %c0_1 = arith.constant 0 : index
    %c0_2 = arith.constant 0 : index
    %1 = vector.load %arg2[%c0_1, %c0_2] : memref<128x544xf32, #tpu.memory_space<vmem>>, vector<128x544xf32>
    %cst = arith.constant dense<0.000000e+00> : vector<2x544xf32>
    %2 = tpu.matmul %0, %1, %cst {dimension_numbers = #tpu.dot_dimension_numbers<[1], [0], [0], [1], [0, 0, 1, 1], [], []>} : vector<2x128xf32>, vector<128x544xf32>, vector<2x544xf32> -> vector<2x544xf32>
    %c0_3 = arith.constant 0 : index
    %c0_4 = arith.constant 0 : index
    %3 = vector.load %arg3[%c0_3, %c0_4] : memref<1x544xf32, #tpu.memory_space<vmem>>, vector<1x544xf32>
    %4 = vector.broadcast %3 : vector<1x544xf32> to vector<2x544xf32>
    %5 = arith.addf %2, %4 : vector<2x544xf32>
    %c0_5 = arith.constant 0 : index
    %c0_6 = arith.constant 0 : index
    %6 = vector.load %arg4[%c0_5, %c0_6] : memref<2x544xf32, #tpu.memory_space<vmem>>, vector<2x544xf32>
    tpu.vector_store %arg4[%c0_5, %c0_6], %5 {strides = array<i32>} : memref<2x544xf32, #tpu.memory_space<vmem>>, vector<2x544xf32>,
    %7 = vector.extract_strided_slice %5 {offsets = [0, 512], sizes = [2, 32], strides = [1, 1]} : vector<2x544xf32> to vector<2x32xf32>
    %8 = arith.negf %7 : vector<2x32xf32>
    %9 = math.exp %8 : vector<2x32xf32>
    %cst_7 = arith.constant 1.000000e+00 : f32
    %10 = vector.broadcast %cst_7 : f32 to vector<2x32xf32>
    %11 = arith.addf %10, %9 : vector<2x32xf32>
    %12 = arith.divf %10, %11 : vector<2x32xf32>
    %c0_8 = arith.constant 0 : index
    %c512 = arith.constant 512 : index
    %13 = vector.load %arg4[%c0_8, %c512] : memref<2x544xf32, #tpu.memory_space<vmem>>, vector<2x32xf32>
    tpu.vector_store %arg4[%c0_8, %c512], %12 {strides = array<i32>} : memref<2x544xf32, #tpu.memory_space<vmem>>, vector<2x32xf32>,
    return
  }
  func.func @transform_0(%arg0: i32) -> (i32, i32) {
    %c0_i32 = arith.constant 0 : i32
    %c0_i32_0 = arith.constant 0 : i32
    return %arg0, %c0_i32 : i32, i32
  }
  func.func @transform_1(%arg0: i32) -> (i32, i32) {
    %c0_i32 = arith.constant 0 : i32
    %c0_i32_0 = arith.constant 0 : i32
    %c0_i32_1 = arith.constant 0 : i32
    return %c0_i32, %c0_i32_0 : i32, i32
  }
  func.func @transform_2(%arg0: i32) -> (i32, i32) {
    %c0_i32 = arith.constant 0 : i32
    %c0_i32_0 = arith.constant 0 : i32
    %c0_i32_1 = arith.constant 0 : i32
    return %c0_i32, %c0_i32_0 : i32, i32
  }
  func.func @transform_3(%arg0: i32) -> (i32, i32) {
    %c0_i32 = arith.constant 0 : i32
    %c0_i32_0 = arith.constant 0 : i32
    return %arg0, %c0_i32 : i32, i32
  }
}

</mosaic_0001>

<bundles_post_ra>
// kernel: tpu_custom_call.1
= control target key start
LH: loop header
LB: loop body
LE: loop exit
PB: predicated region body
PF: predicated region fallthrough
CT: control target
= control target key end

     0   :  { %s565_s0 = inlined_call_operand.vmem [shape: f32[2,128], index: 0, kind: input, shape index: {}]   ;;  %s566_s1 = inlined_call_operand.vmem [shape: f32[128,544], index: 1, kind: input, shape index: {}]   ;;  %s567_s2 = inlined_call_operand.vmem [shape: f32[1,544], index: 2, kind: input, shape index: {}]   ;;  %s568_s3 = inlined_call_operand.hbm [shape: f32[2,544], index: 3, kind: output, shape index: {}]  }
   0x1   :  { %v91_v0 = vld [vmem:[%s566_s1 + $0x258] sm:$0xff]  ;;  %v86_v1 = vld [vmem:[%s566_s1 + $0x230] sm:$0xff]  ;;  %v81_v2 = vld [vmem:[%s566_s1 + $0x208] sm:$0xff] }
   0x2   :  { %108 = vmatpush.msra.mxu0 %v91_v0  ;;  %v93_v3 = vld [vmem:[%s566_s1 + $0x268] sm:$0xff]  ;;  %v94_v4 = vld [vmem:[%s566_s1 + $0x270] sm:$0xff]  ;;  %v88_v5 = vld [vmem:[%s566_s1 + $0x240] sm:$0xff] }
   0x3   :  { %148 = vmatpush.msra.mxu2 %v93_v3  ;;  %v76_v6 = vld [vmem:[%s566_s1 + $0x1e0] sm:$0xff]  ;;  %168 = vmatpush.msra.mxu3 %v94_v4  ;;  %v89_v7 = vld [vmem:[%s566_s1 + $0x248] sm:$0xff]  ;;  %v83_v8 = vld [vmem:[%s566_s1 + $0x218] sm:$0xff] }
   0x4   :  { %109 = vmatpush.msra.mxu0 %v86_v1  ;;  %v84_v9 = vld [vmem:[%s566_s1 + $0x220] sm:$0xff]  ;;  %v71_v11 = vld [vmem:[%s566_s1 + $0x1b8] sm:$0xff]  ;;  %v78_v12 = vld [vmem:[%s566_s1 + $0x1f0] sm:$0xff] }
   0x5   :  { %149 = vmatpush.msra.mxu2 %v88_v5  ;;  %v92_v10 = vld [vmem:[%s566_s1 + $0x260] sm:$0xff]  ;;  %169 = vmatpush.msra.mxu3 %v89_v7  ;;  %v79_v13 = vld [vmem:[%s566_s1 + $0x1f8] sm:$0xff]  ;;  %v66_v15 = vld [vmem:[%s566_s1 + $0x190] sm:$0xff] }
   0x6   :  { %110 = vmatpush.msra.mxu0 %v81_v2  ;;  %128 = vmatpush.msra.mxu1 %v92_v10  ;;  %v87_v14 = vld [vmem:[%s566_s1 + $0x238] sm:$0xff]  ;;  %v73_v16 = vld [vmem:[%s566_s1 + $0x1c8] sm:$0xff]  ;;  %v82_v17 = vld [vmem:[%s566_s1 + $0x210] sm:$0xff] }
   0x7   :  { %150 = vmatpush.msra.mxu2 %v83_v8  ;;  %170 = vmatpush.msra.mxu3 %v84_v9  ;;  %v74_v18 = vld [vmem:[%s566_s1 + $0x1d0] sm:$0xff]  ;;  %v77_v19 = vld [vmem:[%s566_s1 + $0x1e8] sm:$0xff]  ;;  %v68_v21 = vld [vmem:[%s566_s1 + $0x1a0] sm:$0xff] }
   0x8   :  { %111 = vmatpush.msra.mxu0 %v76_v6  ;;  %129 = vmatpush.msra.mxu1 %v87_v14  ;;  %v61_v20 = vld [vmem:[%s566_s1 + $0x168] sm:$0xff]  ;;  %v72_v23 = vld [vmem:[%s566_s1 + $0x1c0] sm:$0xff]  ;;  %v63_v25 = vld [vmem:[%s566_s1 + $0x178] sm:$0xff] }
   0x9   :  { %151 = vmatpush.msra.mxu2 %v78_v12  ;;  %171 = vmatpush.msra.mxu3 %v79_v13  ;;  %v69_v22 = vld [vmem:[%s566_s1 + $0x1a8] sm:$0xff]  ;;  %v56_v24 = vld [vmem:[%s566_s1 + $0x140] sm:$0xff]  ;;  %v67_v27 = vld [vmem:[%s566_s1 + $0x198] sm:$0xff] }
   0xa   :  { %112 = vmatpush.msra.mxu0 %v71_v11  ;;  %130 = vmatpush.msra.mxu1 %v82_v17  ;;  %v64_v26 = vld [vmem:[%s566_s1 + $0x180] sm:$0xff]  ;;  %v51_v28 = vld [vmem:[%s566_s1 + $0x118] sm:$0xff]  ;;  %v58_v29 = vld [vmem:[%s566_s1 + $0x150] sm:$0xff] }
   0xb   :  { %152 = vmatpush.msra.mxu2 %v73_v16  ;;  %172 = vmatpush.msra.mxu3 %v74_v18  ;;  %v59_v30 = vld [vmem:[%s566_s1 + $0x158] sm:$0xff]  ;;  %v62_v31 = vld [vmem:[%s566_s1 + $0x170] sm:$0xff]  ;;  %v53_v33 = vld [vmem:[%s566_s1 + $0x128] sm:$0xff] }
   0xc   :  { %113 = vmatpush.msra.mxu0 %v66_v15  ;;  %131 = vmatpush.msra.mxu1 %v77_v19  ;;  %v46_v32 = vld [vmem:[%s566_s1 + $0xf0] sm:$0xff]  ;;  %v57_v35 = vld [vmem:[%s566_s1 + $0x148] sm:$0xff]  ;;  %v48_v37 = vld [vmem:[%s566_s1 + $0x100] sm:$0xff] }
   0xd   :  { %153 = vmatpush.msra.mxu2 %v68_v21  ;;  %173 = vmatpush.msra.mxu3 %v69_v22  ;;  %v54_v34 = vld [vmem:[%s566_s1 + $0x130] sm:$0xff]  ;;  %v41_v36 = vld [vmem:[%s566_s1 + $0xc8] sm:$0xff]  ;;  %v52_v39 = vld [vmem:[%s566_s1 + $0x120] sm:$0xff] }
   0xe   :  { %114 = vmatpush.msra.mxu0 %v61_v20  ;;  %132 = vmatpush.msra.mxu1 %v72_v23  ;;  %v49_v38 = vld [vmem:[%s566_s1 + $0x108] sm:$0xff]  ;;  %v36_v40 = vld [vmem:[%s566_s1 + $0xa0] sm:$0xff]  ;;  %v43_v41 = vld [vmem:[%s566_s1 + $0xd8] sm:$0xff] }
   0xf   :  { %154 = vmatpush.msra.mxu2 %v63_v25  ;;  %174 = vmatpush.msra.mxu3 %v64_v26  ;;  %v44_v42 = vld [vmem:[%s566_s1 + $0xe0] sm:$0xff]  ;;  %v47_v43 = vld [vmem:[%s566_s1 + $0xf8] sm:$0xff]  ;;  %v38_v45 = vld [vmem:[%s566_s1 + $0xb0] sm:$0xff] }
  0x10   :  { %115 = vmatpush.msra.mxu0 %v56_v24  ;;  %133 = vmatpush.msra.mxu1 %v67_v27  ;;  %v31_v44 = vld [vmem:[%s566_s1 + $0x78] sm:$0xff]  ;;  %v42_v47 = vld [vmem:[%s566_s1 + $0xd0] sm:$0xff]  ;;  %v33_v49 = vld [vmem:[%s566_s1 + $0x88] sm:$0xff] }
  0x11   :  { %155 = vmatpush.msra.mxu2 %v58_v29  ;;  %175 = vmatpush.msra.mxu3 %v59_v30  ;;  %v39_v46 = vld [vmem:[%s566_s1 + $0xb8] sm:$0xff]  ;;  %v26_v48 = vld [vmem:[%s566_s1 + $0x50] sm:$0xff]  ;;  %v37_v51 = vld [vmem:[%s566_s1 + $0xa8] sm:$0xff] }
  0x12   :  { %116 = vmatpush.msra.mxu0 %v51_v28  ;;  %134 = vmatpush.msra.mxu1 %v62_v31  ;;  %v34_v50 = vld [vmem:[%s566_s1 + $0x90] sm:$0xff]  ;;  %v21_v52 = vld [vmem:[%s566_s1 + $0x28] sm:$0xff]  ;;  %v28_v53 = vld [vmem:[%s566_s1 + $0x60] sm:$0xff] }
  0x13   :  { %156 = vmatpush.msra.mxu2 %v53_v33  ;;  %176 = vmatpush.msra.mxu3 %v54_v34 }
  0x14   :  { %117 = vmatpush.msra.mxu0 %v46_v32  ;;  %135 = vmatpush.msra.mxu1 %v57_v35 }
  0x15   :  { %157 = vmatpush.msra.mxu2 %v48_v37  ;;  %177 = vmatpush.msra.mxu3 %v49_v38 }
  0x16   :  { %118 = vmatpush.msra.mxu0 %v41_v36  ;;  %136 = vmatpush.msra.mxu1 %v52_v39 }
  0x17   :  { %158 = vmatpush.msra.mxu2 %v43_v41  ;;  %178 = vmatpush.msra.mxu3 %v44_v42 }
  0x18   :  { %119 = vmatpush.msra.mxu0 %v36_v40  ;;  %137 = vmatpush.msra.mxu1 %v47_v43 }
  0x19   :  { %159 = vmatpush.msra.mxu2 %v38_v45  ;;  %179 = vmatpush.msra.mxu3 %v39_v46 }
  0x1a   :  { %120 = vmatpush.msra.mxu0 %v31_v44  ;;  %138 = vmatpush.msra.mxu1 %v42_v47 }
  0x1b   :  { %8 = vsyncpa [#allocation3], 0  ;;  %160 = vmatpush.msra.mxu2 %v33_v49  ;;  %v29_v54 = vld [vmem:[%s566_s1 + $0x68] sm:$0xff]  ;;  %v32_v55 = vld [vmem:[%s566_s1 + $0x80] sm:$0xff]  ;;  %180 = vmatpush.msra.mxu3 %v34_v50  ;;  %vm215_vm0 = vcmask 1041408   ;;  %vm217_vm1 = vcmask 1045508  }
  0x1c   :  { %121 = vmatpush.msra.mxu0 %v26_v48  ;;  %v16_v56 = vld [vmem:[%s566_s1] sm:$0xff]  ;;  %139 = vmatpush.msra.mxu1 %v37_v51  ;;  %v23_v57 = vld [vmem:[%s566_s1 + $0x38] sm:$0xff]  ;;  %v18_v60 = vld [vmem:[%s566_s1 + $0x10] sm:$0xff]  ;;  %vm219_vm2 = vcmask 1043456   ;;  %vm223_vm3 = vcmask 254976   ;;  %s252_s14 = sshll.u32 %s568_s3, 4  ;;  %s253_s14 = int_to_ptr.hbm [resolvable:$true] %s252_s14 }
  0x1d   :  { %v95_v58 = vld [vmem:[%s566_s1 + $0x278] sm:$0xff]  ;;  %161 = vmatpush.msra.mxu2 %v28_v53  ;;  %v24_v59 = vld [vmem:[%s566_s1 + $0x40] sm:$0xff]  ;;  %181 = vmatpush.msra.mxu3 %v29_v54  ;;  %v90_v62 = vld [vmem:[%s566_s1 + $0x250] sm:$0xff] }
  0x1e   :  { %122 = vmatpush.msra.mxu0 %v21_v52  ;;  %140 = vmatpush.msra.mxu1 %v32_v55  ;;  %v27_v61 = vld [vmem:[%s566_s1 + $0x58] sm:$0xff]  ;;  %v15_v0 = vld [vmem:[%s565_s0] sm:$0x3]  ;;  %v85_v1 = vld [vmem:[%s566_s1 + $0x228] sm:$0xff] }
  0x1f   :  { %162 = vmatpush.msra.mxu2 %v23_v57  ;;  %v19_v63 = vld [vmem:[%s566_s1 + $0x18] sm:$0xff]  ;;  %182 = vmatpush.msra.mxu3 %v24_v59  ;;  %v22_v2 = vld [vmem:[%s566_s1 + $0x30] sm:$0xff]  ;;  %v80_v3 = vld [vmem:[%s566_s1 + $0x200] sm:$0xff] }
  0x20   :  { %123 = vmatpush.msra.mxu0 %v16_v56  ;;  %141 = vmatpush.msra.mxu1 %v27_v61  ;;  %v17_v4 = vld [vmem:[%s566_s1 + $0x8] sm:$0xff]  ;;  %v75_v5 = vld [vmem:[%s566_s1 + $0x1d8] sm:$0xff]  ;;  %v70_v6 = vld [vmem:[%s566_s1 + $0x1b0] sm:$0xff] }
  0x21   :  { %163 = vmatpush.msra.mxu2 %v18_v60  ;;  %183 = vmatpush.msra.mxu3 %v19_v63  ;;  %v65_v7 = vld [vmem:[%s566_s1 + $0x188] sm:$0xff]  ;;  %v60_v8 = vld [vmem:[%s566_s1 + $0x160] sm:$0xff]  ;;  %v55_v9 = vld [vmem:[%s566_s1 + $0x138] sm:$0xff] }
  0x22   :  { %188 = vmatpush.msrb.mxu0 %v95_v58  ;;  %164 = vmatmul.f32.vlgmr.msra.gmra.mxu2 %v15_v0  ;;  %v50_v10 = vld [vmem:[%s566_s1 + $0x110] sm:$0xff]  ;;  %v45_v11 = vld [vmem:[%s566_s1 + $0xe8] sm:$0xff]  ;;  %v40_v12 = vld [vmem:[%s566_s1 + $0xc0] sm:$0xff] }
  0x23   :  { %184 = vmatmul.f32.vlgmr.msra.gmra.mxu3 %v15_v0  ;;  %142 = vmatpush.msra.mxu1 %v22_v2  ;;  %v35_v13 = vld [vmem:[%s566_s1 + $0x98] sm:$0xff]  ;;  %v30_v14 = vld [vmem:[%s566_s1 + $0x70] sm:$0xff]  ;;  %v25_v15 = vld [vmem:[%s566_s1 + $0x48] sm:$0xff] }
  0x24   :  { %189 = vmatpush.msrb.mxu0 %v90_v62  ;;  %v20_v16 = vld [vmem:[%s566_s1 + $0x20] sm:$0xff]  ;;  %s293_s1 = smov [#allocation2]  }
  0x25   :  { %124 = vmatmul.f32.vlgmr.msra.gmra.mxu0 %v15_v0  ;;  %143 = vmatpush.msra.mxu1 %v17_v4  ;;  %v96_v17 = vld [vmem:[%s567_s2] sm:$0x1f]  ;;  %s250_s2 = sshll.u32 %s293_s1, 4  ;;  %s251_s2 = int_to_ptr.vmem [resolvable:$true] %s250_s2 }
  0x26   :  { %190 = vmatpush.msrb.mxu0 %v85_v1  ;;  %144 = vmatmul.f32.vlgmr.msra.gmra.mxu1 %v15_v0  ;;  %v99_v18 = vperm.slane %v96_v17, 1  ;;  %v98_v19 = vperm.slane %v96_v17, 0  ;;  %v100_v21 = vperm.slane %v96_v17, 2  ;;  %v101_v22 = vperm.slane %v96_v17, 3 }
  0x27   :  { %v102_v36 = vperm.slane %v96_v17, 4 }
  0x28   :  { %191 = vmatpush.msrb.mxu0 %v80_v3 }
  0x2a   :  { %192 = vmatpush.msrb.mxu0 %v75_v5 }
  0x2c   :  { %193 = vmatpush.msrb.mxu0 %v70_v6 }
  0x2e   :  { %194 = vmatpush.msrb.mxu0 %v65_v7 }
  0x30   :  { %195 = vmatpush.msrb.mxu0 %v60_v8 }
  0x32   :  { %196 = vmatpush.msrb.mxu0 %v55_v9 }
  0x34   :  { %197 = vmatpush.msrb.mxu0 %v50_v10 }
  0x36   :  { %198 = vmatpush.msrb.mxu0 %v45_v11 }
  0x38   :  { %199 = vmatpush.msrb.mxu0 %v40_v12 }
  0x3a   :  { %200 = vmatpush.msrb.mxu0 %v35_v13 }
  0x3c   :  { %201 = vmatpush.msrb.mxu0 %v30_v14 }
  0x3e   :  { %202 = vmatpush.msrb.mxu0 %v25_v15 }
  0x40   :  { %203 = vmatpush.msrb.mxu0 %v20_v16 }
  0x41   :  { %204 = vmatmul.f32.vlgmr.msrb.gmra.mxu0 %v15_v0 }
  0xa2   :  { %v125_v20 = vpop.f32.mrf.mxu0 }
  0xa3   :  { %v145_v23 = vpop.f32.mrf.mxu1  ;;  %v126_v25 = vadd.f32 %v125_v20, %v98_v19 }
  0xa4   :  { %v146_v24 = vadd.f32 %v145_v23, %v99_v18 }
  0xa5   :  { %v165_v26 = vpop.f32.mrf.mxu2 }
  0xa6   :  { %v185_v27 = vpop.f32.mrf.mxu3  ;;  %v212_v28 = vrot.slane %v146_v24, 6  ;;  %v166_v29 = vadd.f32 %v165_v26, %v100_v21 }
  0xa7   :  { %v186_v30 = vadd.f32 %v185_v27, %v101_v22 }
  0xa8   :  { %v213_v31 = vrot.slane %v166_v29, 4  ;;  %v216_v33 = vsel %vm215_vm0, %v126_v25, %v212_v28 }
  0xa9   :  { %v214_v32 = vrot.slane %v186_v30, 2 }
  0xab   :  { %v218_v34 = vsel %vm217_vm1, %v213_v31, %v214_v32 }
  0xac   :  { %v220_v35 = vsel %vm219_vm2, %v216_v33, %v218_v34 }
  0xad   :  { %222 = vst [vmem:[#allocation2] sm:$0xff] %v220_v35 }
  0xbe   :  { %v205_v37 = vpop.f32.mrf.mxu0 }
  0xbf   :  { %v206_v38 = vadd.f32 %v205_v37, %v102_v36 }
  0xc1   :  { %224 = vst.msk [vmem:[#allocation2 + $0x8] sm:$0x3] %vm223_vm3, %v206_v38  ;;  %v261_v39 = vmul.f32 -1.442695, %v206_v38 }
  0xc3   :  { %263 = vpow2.f32 %v261_v39 }
  0xc9   :  { %v264_v40 = vpop.eup %263 }
  0xca   :  { %v228_v41 = vadd.f32 1.0, %v264_v40 }
  0xcc   :  { %265 = vrcp.f32 %v228_v41  ;;  %v240_v45 = vand.u32 2147483648, %v228_v41  ;;  %v238_v47 = vand.u32 2147483647, %v228_v41  ;;  %vm234_vm5 = vweird.f32 %v228_v41 }
  0xce   :  { %v241_v49 = vor.u32 1.1754944e-38, %v240_v45  ;;  %vm239_vm7 = vcmp.eq.f32.partialorder %v238_v47, 8.507059e+37 }
  0xd2   :  { %v266_v42 = vpop.eup %265 }
  0xd3   :  { %v230_v43 = vmul.f32 %v266_v42, %v228_v41  ;;  %vm235_vm4 = vweird.f32 %v266_v42 }
  0xd4   :  { %vm236_vm6 = vmor %vm234_vm5, %vm235_vm4 }
  0xd5   :  { %v231_v44 = vsub.f32 1.0, %v230_v43 }
  0xd7   :  { %v232_v46 = vmul.f32 %v266_v42, %v231_v44 }
  0xd9   :  { %v233_v48 = vadd.f32 %v266_v42, %v232_v46 }
  0xdb   :  { %v237_v50 = vsel %vm236_vm6, %v266_v42, %v233_v48 }
  0xdc   :  { %v242_v51 = vsel %vm239_vm7, %v241_v49, %v237_v50 }
  0xdd   :  { %244 = vst.msk [vmem:[#allocation2 + $0x8] sm:$0x3] %vm223_vm3, %v242_v51 }
  0xde   :  { %255 = dma.vmem_to_hbm [thread:$0]  %s251_s2, 160, %s253_s14, [#allocation3]  }
  0xdf   :  { %291 = dma.done.wait [#allocation3], 160  }
  0xe0   :  { %292 = vsyncadd [#allocation3], 4294967136 }
  0xe1   :  { %260 = vsyncpa [#allocation3], 1 }

</bundles_post_ra>
